<compile_context>
chip_gen: v7x
topology: tpu7x:2x2x1
jax: 0.10.0
libtpu: 0.0.40
codegen_flags: <defaults>
</compile_context>

<pallas_src>
import functools

import jax
import jax.numpy as jnp
from jax.experimental import pallas as pl
from jax.experimental.pallas import tpu as pltpu


def _round_up(x, m):
    return ((x + m - 1) // m) * m


# ----------------------------------------------------------------------------
# Fused MLP kernel:  out = Wn(... relu(W2 relu(W1 x + b1) + b2) ...) + bn
# refs = (w1, b1, w2, b2, ..., wn, bn, out_ref)
# ----------------------------------------------------------------------------
def _mlp_kernel(x_ref, *refs, num_layers):
    out_ref = refs[-1]
    wb_refs = refs[:-1]
    h = x_ref[...]                                       # (tm, in_dim), bf16
    for i in range(num_layers):
        w = wb_refs[2 * i][...]                          # (n_in, n_out), bf16
        b = wb_refs[2 * i + 1][...]                      # (1,  n_out), f32
        y = jnp.dot(h, w, preferred_element_type=jnp.float32) + b
        if i < num_layers - 1:
            h = jnp.maximum(y, 0.0).astype(x_ref.dtype)  # bf16 for next MXU pass
        else:
            out_ref[...] = y.astype(out_ref.dtype)


def mlp_forward(x, weights, biases, *, tm=256,
                compute_dtype=jnp.bfloat16, out_dtype=jnp.float32):
    """Fused MLP forward. x: (..., input_dim). weights[i]: (n_in, n_out)."""
    *lead, in_dim = x.shape
    num_layers = len(weights)
    out_dim = weights[-1].shape[1]

    rows = 1
    for d in lead:
        rows *= d

    # Keep at least 2 grid steps when possible (v7x has 2 TensorCores / chip).
    if rows < 2 * tm:
        tm = max(8, _round_up(max(rows // 2, 1), 8))
    rows_pad = _round_up(rows, tm)

    # Lane-pad the final output so stores are unmasked (multiple of 128 lanes).
    out_pad = _round_up(out_dim, 128)

    x_flat = x.reshape(rows, in_dim).astype(compute_dtype)
    if rows_pad != rows:
        x_flat = jnp.pad(x_flat, ((0, rows_pad - rows), (0, 0)))

    ws = [w.astype(compute_dtype) for w in weights]
    bs = [b.astype(jnp.float32).reshape(1, -1) for b in biases]
    if out_pad != out_dim:
        ws[-1] = jnp.pad(ws[-1], ((0, 0), (0, out_pad - out_dim)))
        bs[-1] = jnp.pad(bs[-1], ((0, 0), (0, out_pad - out_dim)))

    const = lambda i: (0, 0)
    in_specs = [pl.BlockSpec((tm, in_dim), lambda i: (i, 0))]
    flat_wb = []
    for w, b in zip(ws, bs):
        in_specs.append(pl.BlockSpec(w.shape, const))  # whole weight resident
        in_specs.append(pl.BlockSpec(b.shape, const))
        flat_wb.extend([w, b])

    flops = 2 * rows_pad * sum(int(w.shape[0]) * int(w.shape[1]) for w in ws)
    bytes_accessed = (
        x_flat.size * x_flat.dtype.itemsize
        + sum(int(a.size) * a.dtype.itemsize for a in flat_wb)
        + rows_pad * out_pad * jnp.dtype(out_dtype).itemsize)

    out = pl.pallas_call(
        functools.partial(_mlp_kernel, num_layers=num_layers),
        out_shape=jax.ShapeDtypeStruct((rows_pad, out_pad), out_dtype),
        grid_spec=pltpu.PrefetchScalarGridSpec(
            num_scalar_prefetch=0,
            grid=(rows_pad // tm,),
            in_specs=in_specs,
            out_specs=pl.BlockSpec((tm, out_pad), lambda i: (i, 0)),
        ),
        compiler_params=pltpu.CompilerParams(
            dimension_semantics=("parallel",)),
        cost_estimate=pl.CostEstimate(
            flops=flops, transcendentals=0, bytes_accessed=bytes_accessed),
    )(x_flat, *flat_wb)

    out = out[:rows, :out_dim]
    return out.reshape(*lead, out_dim)


def mlp_reference(x, weights, biases, compute_dtype=jnp.bfloat16):
    """Pure-JAX reference with the same bf16 input/intermediate rounding."""
    h = x.astype(compute_dtype).astype(jnp.float32)
    n = len(weights)
    for i, (w, b) in enumerate(zip(weights, biases)):
        y = h @ w.astype(compute_dtype).astype(jnp.float32) + b.astype(jnp.float32)
        h = (jnp.maximum(y, 0.0).astype(compute_dtype).astype(jnp.float32)
             if i < n - 1 else y)
    return h


# ----------------------------------------------------------------------------
# main
# ----------------------------------------------------------------------------
if __name__ == "__main__":
    key = jax.random.PRNGKey(0)
    k = jax.random.split(key, 8)

    # MLP(input_dim=128, hidden_dim=128, output_dim=4, num_layers=3)
    # (the bbox-regression FFN configuration this module is used for).
    IN, HID, OUT, NLAYERS = 128, 128, 4, 3
    dims = [IN] + [HID] * (NLAYERS - 1) + [OUT]
    s = 0.02
    weights = [jax.random.normal(k[i], (dims[i], dims[i + 1]), jnp.float32) * s
               for i in range(NLAYERS)]
    biases = [jax.random.normal(k[NLAYERS + i], (dims[i + 1],), jnp.float32) * s
              for i in range(NLAYERS)]

    # (batch, seq, in_dim) -> 512 rows -> two 256-row grid steps.
    x = jax.random.normal(k[6], (4, 128, IN), jnp.float32)
    out = jax.block_until_ready(mlp_forward(x, weights, biases))
    ref = mlp_reference(x, weights, biases)
    assert out.shape == (4, 128, OUT)
    assert jnp.allclose(out, ref, atol=1e-2, rtol=1e-2), \
        float(jnp.max(jnp.abs(out - ref)))

    # Ragged row count (exercises row padding; no rows % tm assert anymore).
    x2 = jax.random.normal(k[7], (2, 100, IN), jnp.float32)
    out2 = jax.block_until_ready(mlp_forward(x2, weights, biases))
    ref2 = mlp_reference(x2, weights, biases)
    assert out2.shape == (2, 100, OUT)
    assert jnp.allclose(out2, ref2, atol=1e-2, rtol=1e-2), \
        float(jnp.max(jnp.abs(out2 - ref2)))

    print("KERNEL_OK")
</pallas_src>

<mosaic_0001>
module attributes {stable_mosaic.version = 11 : i64} {
  func.func @_mlp_kernel(%arg0: i32, %arg1: memref<256x128xbf16, #tpu.memory_space<vmem>>, %arg2: memref<128x128xbf16, #tpu.memory_space<vmem>>, %arg3: memref<1x128xf32, #tpu.memory_space<vmem>>, %arg4: memref<128x128xbf16, #tpu.memory_space<vmem>>, %arg5: memref<1x128xf32, #tpu.memory_space<vmem>>, %arg6: memref<128x128xbf16, #tpu.memory_space<vmem>>, %arg7: memref<1x128xf32, #tpu.memory_space<vmem>>, %arg8: memref<256x128xf32, #tpu.memory_space<vmem>>) attributes {dimension_semantics = [#tpu.dimension_semantics<parallel>], iteration_bounds = array<i64: 2>, scalar_prefetch = 0 : i64, scratch_operands = 0 : i64, tpu.core_type = #tpu.core_type<tc>, window_params = [{transform_indices = @transform_0, window_bounds = array<i64: 256, 128>}, {pipeline_mode = #tpu.pipeline_mode<synchronous>, transform_indices = @transform_1, window_bounds = array<i64: 128, 128>}, {pipeline_mode = #tpu.pipeline_mode<synchronous>, transform_indices = @transform_2, window_bounds = array<i64: 1, 128>}, {pipeline_mode = #tpu.pipeline_mode<synchronous>, transform_indices = @transform_3, window_bounds = array<i64: 128, 128>}, {pipeline_mode = #tpu.pipeline_mode<synchronous>, transform_indices = @transform_4, window_bounds = array<i64: 1, 128>}, {pipeline_mode = #tpu.pipeline_mode<synchronous>, transform_indices = @transform_5, window_bounds = array<i64: 128, 128>}, {pipeline_mode = #tpu.pipeline_mode<synchronous>, transform_indices = @transform_6, window_bounds = array<i64: 1, 128>}, {transform_indices = @transform_7, window_bounds = array<i64: 256, 128>}]} {
    %c0 = arith.constant 0 : index
    %c0_0 = arith.constant 0 : index
    %0 = vector.load %arg1[%c0, %c0_0] : memref<256x128xbf16, #tpu.memory_space<vmem>>, vector<256x128xbf16>
    %c0_1 = arith.constant 0 : index
    %c0_2 = arith.constant 0 : index
    %1 = vector.load %arg2[%c0_1, %c0_2] : memref<128x128xbf16, #tpu.memory_space<vmem>>, vector<128x128xbf16>
    %c0_3 = arith.constant 0 : index
    %c0_4 = arith.constant 0 : index
    %2 = vector.load %arg3[%c0_3, %c0_4] : memref<1x128xf32, #tpu.memory_space<vmem>>, vector<1x128xf32>
    %cst = arith.constant dense<0.000000e+00> : vector<256x128xf32>
    %3 = tpu.matmul %0, %1, %cst {dimension_numbers = #tpu.dot_dimension_numbers<[1], [0], [0], [1], [0, 0, 1, 1], [], []>} : vector<256x128xbf16>, vector<128x128xbf16>, vector<256x128xf32> -> vector<256x128xf32>
    %4 = vector.broadcast %2 : vector<1x128xf32> to vector<256x128xf32>
    %5 = arith.addf %3, %4 : vector<256x128xf32>
    %cst_5 = arith.constant 0.000000e+00 : f32
    %6 = vector.broadcast %cst_5 : f32 to vector<256x128xf32>
    %7 = arith.maximumf %5, %6 : vector<256x128xf32>
    %8 = arith.truncf %7 : vector<256x128xf32> to vector<256x128xbf16>
    %c0_6 = arith.constant 0 : index
    %c0_7 = arith.constant 0 : index
    %9 = vector.load %arg4[%c0_6, %c0_7] : memref<128x128xbf16, #tpu.memory_space<vmem>>, vector<128x128xbf16>
    %c0_8 = arith.constant 0 : index
    %c0_9 = arith.constant 0 : index
    %10 = vector.load %arg5[%c0_8, %c0_9] : memref<1x128xf32, #tpu.memory_space<vmem>>, vector<1x128xf32>
    %cst_10 = arith.constant dense<0.000000e+00> : vector<256x128xf32>
    %11 = tpu.matmul %8, %9, %cst_10 {dimension_numbers = #tpu.dot_dimension_numbers<[1], [0], [0], [1], [0, 0, 1, 1], [], []>} : vector<256x128xbf16>, vector<128x128xbf16>, vector<256x128xf32> -> vector<256x128xf32>
    %12 = vector.broadcast %10 : vector<1x128xf32> to vector<256x128xf32>
    %13 = arith.addf %11, %12 : vector<256x128xf32>
    %cst_11 = arith.constant 0.000000e+00 : f32
    %14 = vector.broadcast %cst_11 : f32 to vector<256x128xf32>
    %15 = arith.maximumf %13, %14 : vector<256x128xf32>
    %16 = arith.truncf %15 : vector<256x128xf32> to vector<256x128xbf16>
    %c0_12 = arith.constant 0 : index
    %c0_13 = arith.constant 0 : index
    %17 = vector.load %arg6[%c0_12, %c0_13] : memref<128x128xbf16, #tpu.memory_space<vmem>>, vector<128x128xbf16>
    %c0_14 = arith.constant 0 : index
    %c0_15 = arith.constant 0 : index
    %18 = vector.load %arg7[%c0_14, %c0_15] : memref<1x128xf32, #tpu.memory_space<vmem>>, vector<1x128xf32>
    %cst_16 = arith.constant dense<0.000000e+00> : vector<256x128xf32>
    %19 = tpu.matmul %16, %17, %cst_16 {dimension_numbers = #tpu.dot_dimension_numbers<[1], [0], [0], [1], [0, 0, 1, 1], [], []>} : vector<256x128xbf16>, vector<128x128xbf16>, vector<256x128xf32> -> vector<256x128xf32>
    %20 = vector.broadcast %18 : vector<1x128xf32> to vector<256x128xf32>
    %21 = arith.addf %19, %20 : vector<256x128xf32>
    %c0_17 = arith.constant 0 : index
    %c0_18 = arith.constant 0 : index
    %22 = vector.load %arg8[%c0_17, %c0_18] : memref<256x128xf32, #tpu.memory_space<vmem>>, vector<256x128xf32>
    tpu.vector_store %arg8[%c0_17, %c0_18], %21 {strides = array<i32>} : memref<256x128xf32, #tpu.memory_space<vmem>>, vector<256x128xf32>,
    return
  }
  func.func @transform_0(%arg0: i32) -> (i32, i32) {
    %c0_i32 = arith.constant 0 : i32
    %c0_i32_0 = arith.constant 0 : i32
    return %arg0, %c0_i32 : i32, i32
  }
  func.func @transform_1(%arg0: i32) -> (i32, i32) {
    %c0_i32 = arith.constant 0 : i32
    %c0_i32_0 = arith.constant 0 : i32
    %c0_i32_1 = arith.constant 0 : i32
    return %c0_i32, %c0_i32_0 : i32, i32
  }
  func.func @transform_2(%arg0: i32) -> (i32, i32) {
    %c0_i32 = arith.constant 0 : i32
    %c0_i32_0 = arith.constant 0 : i32
    %c0_i32_1 = arith.constant 0 : i32
    return %c0_i32, %c0_i32_0 : i32, i32
  }
  func.func @transform_3(%arg0: i32) -> (i32, i32) {
    %c0_i32 = arith.constant 0 : i32
    %c0_i32_0 = arith.constant 0 : i32
    %c0_i32_1 = arith.constant 0 : i32
    return %c0_i32, %c0_i32_0 : i32, i32
  }
  func.func @transform_4(%arg0: i32) -> (i32, i32) {
    %c0_i32 = arith.constant 0 : i32
    %c0_i32_0 = arith.constant 0 : i32
    %c0_i32_1 = arith.constant 0 : i32
    return %c0_i32, %c0_i32_0 : i32, i32
  }
  func.func @transform_5(%arg0: i32) -> (i32, i32) {
    %c0_i32 = arith.constant 0 : i32
    %c0_i32_0 = arith.constant 0 : i32
    %c0_i32_1 = arith.constant 0 : i32
    return %c0_i32, %c0_i32_0 : i32, i32
  }
  func.func @transform_6(%arg0: i32) -> (i32, i32) {
    %c0_i32 = arith.constant 0 : i32
    %c0_i32_0 = arith.constant 0 : i32
    %c0_i32_1 = arith.constant 0 : i32
    return %c0_i32, %c0_i32_0 : i32, i32
  }
  func.func @transform_7(%arg0: i32) -> (i32, i32) {
    %c0_i32 = arith.constant 0 : i32
    %c0_i32_0 = arith.constant 0 : i32
    return %arg0, %c0_i32 : i32, i32
  }
}

</mosaic_0001>

<bundles_post_ra>
// kernel: tpu_custom_call.1
= control target key start
LH: loop header
LB: loop body
LE: loop exit
PB: predicated region body
PF: predicated region fallthrough
CT: control target
= control target key end

     0   :  { %12 = vsyncpa [#allocation3], 0  ;;  %s2517_s0 = inlined_call_operand.hbm [shape: bf16[512,128], index: 0, kind: input, shape index: {}]   ;;  %s2518_s1 = inlined_call_operand.hbm [shape: bf16[128,128], index: 1, kind: input, shape index: {}]   ;;  %s2519_s2 = inlined_call_operand.vmem [shape: f32[1,128], index: 2, kind: input, shape index: {}]   ;;  %s2520_s3 = inlined_call_operand.hbm [shape: bf16[128,128], index: 3, kind: input, shape index: {}]   ;;  %s2521_s4 = inlined_call_operand.vmem [shape: f32[1,128], index: 4, kind: input, shape index: {}]   ;;  %s2522_s5 = inlined_call_operand.hbm [shape: bf16[128,128], index: 5, kind: input, shape index: {}]   ;;  %s2523_s6 = inlined_call_operand.vmem [shape: f32[1,128], index: 6, kind: input, shape index: {}]   ;;  %s2524_s7 = inlined_call_operand.hbm [shape: f32[512,128], index: 7, kind: output, shape index: {}]  }
   0x1   :  { %14 = vsyncpa [#allocation3 + $0x1], 0 }
   0x2   :  { %15 = vsyncpa [#allocation6], 0 }
   0x3   :  { %16 = vsyncpa [#allocation9], 0 }
   0x4   :  { %17 = vsyncpa [#allocation4], 0 }
   0x5   :  { %19 = vsyncpa [#allocation4 + $0x1], 0  ;;  %s2069_s24 = smov 0   ;;  %s2071_s25 = smov 0  }
   0x6   :  { %s2073_s26 = smov 0   ;;  %s2075_s27 = smov 0  }
   0x7 LB: > { %s2090_s28 = sadd.s32 4294967295, %s2018_s27   ;;  %s1412_s29 = sadd.s32 4294967294, %s2018_s27   ;;  %s2018_s27 = sphi %s2075_s27, %s2550_s27   ;;  %s2014_s26 = sphi %s2073_s26, %s2549_s26   ;;  %s2010_s25 = sphi %s2071_s25, %s2548_s25   ;;  %s2006_s24 = sphi %s2069_s24, %s2547_s24  }
   0x8   : > { %p45_p0 = scmp.ne.s32.totalorder %s2010_s25, %s2006_s24  ;;  %p2525_p1 = scmp.eq.s32.totalorder %s2090_s28, 0 }
   0x9   : > { %p201_p3 = scmp.eq.s32.totalorder %s1412_s29, 1  ;;  %p1413_p5 = scmp.ge.s32.totalorder %s2018_s27, 1 }
   0xa   : > { %p2099_p4 = por %p2525_p1, %p45_p0  ;;  %p208_p7 = scmp.lt.s32.totalorder %s2018_s27, 3 }
   0xb   : > { %p2104_p6 = por %p201_p3, %p45_p0  ;;  %s2020_s10 = smov [#allocation5]  }
   0xc   : > { %s2529_s30 = scalar_select %p2099_p4, 1, 0 }
   0xd   : > { %s2530_s8 = scalar_select %p2104_p6, 1, 0 }
   0xe   : > { %p2109_p8 = pnand %p1413_p5, %p208_p7  ;;  %s220_s11 = sshll.u32 %s2020_s10, 4  ;;  %s2113_s11 = int_to_ptr.vmem [resolvable:$true] %s220_s11 }
   0xf   : > { %2531 = sst [smem:[#allocation15_spill]] %s2530_s8  ;;  %s2021_s13 = smov [#allocation7]  }
  0x10   : > { %s2532_s9 = scalar_select %p2109_p8, 1, 0 }
  0x11   : > { %p1725_p9 = pneg %p2109_p8  ;;  %s236_s14 = sshll.u32 %s2021_s13, 4  ;;  %s2124_s14 = int_to_ptr.vmem [resolvable:$true] %s236_s14 }
  0x12   : > { %s2022_s15 = smov [#allocation8]   ;;  %s1830_s19 = scalar_lea.hbm %s2518_s1, 1024 }
  0x13   : > { %p2120_p11 = pnand %p1725_p9, %p2525_p1  ;;  %s2126_s16 = sshll.u32 %s2022_s15, 4  ;;  %s253_s16 = int_to_ptr.vmem [resolvable:$true] %s2126_s16 }
  0x14   : > { %p1831_p12 = scmp.ne.s32.totalorder %s2518_s1, %s1830_s19  ;;  %p1837_p5 = scmp.lt.u32.totalorder %s1830_s19, %s2518_s1 }
  0x15   : > { %p2136_p13 = pneg %p2120_p11 }
  0x17   : > { %p1833_p0 = pnand %p2136_p13, %p1831_p12 }
  0x19   : > { %p1834_p3 = pneg %p1833_p0 }
  0x1b   : > { %p1839_p7 = pnand %p1837_p5, %p1834_p3 }
  0x1d   : > { %1842 = shalt.err (!%p1839_p7)
}
  0x1e   : > { %s1843_s10 = scalar_lea.vmem %s2113_s11, 1024  ;;  %p1851_p2 = scmp.lt.s32.totalorder %s2113_s11, %s2113_s11 }
  0x1f   : > { %p1844_p9 = scmp.ne.s32.totalorder %s2113_s11, %s1843_s10  ;;  %p1852_p6 = scmp.lt.s32.totalorder %s1843_s10, %s1843_s10 }
  0x21   : > { %p1846_p10 = pnand %p1844_p9, %p2136_p13  ;;  %p1853_p12 = por %p1852_p6, %p1851_p2 }
  0x23   : > { %p1847_p1 = pneg %p1846_p10 }
  0x25   : > { %p1854_p0 = pnand %p1853_p12, %p1847_p1 }
  0x27   : > { %1857 = shalt.err (!%p1854_p0)
}
  0x28   : > { %s2023_s13 = smov 64   ;;  %s2024_s15 = smov 4  }
  0x29   : > { %1728 = dma.hbm_to_vmem [thread:$0]  (!%p2120_p11), %s2518_s1, 1024, %s2113_s11, [#allocation6], %s2023_s13, %s2023_s13, %s2024_s15  }
  0x2a   : > { %s1858_s21 = scalar_lea.hbm %s2520_s3, 1024 }
  0x2b   : > { %p1859_p1 = scmp.ne.s32.totalorder %s2520_s3, %s1858_s21  ;;  %p1865_p10 = scmp.lt.u32.totalorder %s1858_s21, %s2520_s3 }
  0x2d   : > { %p1861_p2 = pnand %p1859_p1, %p2136_p13 }
  0x2f   : > { %p1862_p6 = pneg %p1861_p2 }
  0x31   : > { %p1867_p3 = pnand %p1865_p10, %p1862_p6 }
  0x33   : > { %1870 = shalt.err (!%p1867_p3)
}
  0x34   : > { %s1871_s11 = scalar_lea.vmem %s2124_s14, 1024  ;;  %p1879_p12 = scmp.lt.s32.totalorder %s2124_s14, %s2124_s14 }
  0x35   : > { %p1872_p5 = scmp.ne.s32.totalorder %s2124_s14, %s1871_s11  ;;  %p1880_p0 = scmp.lt.s32.totalorder %s1871_s11, %s1871_s11 }
  0x37   : > { %p1874_p7 = pnand %p1872_p5, %p2136_p13  ;;  %p1881_p1 = por %p1880_p0, %p1879_p12 }
  0x39   : > { %p1875_p9 = pneg %p1874_p7 }
  0x3b   : > { %p1882_p2 = pnand %p1881_p1, %p1875_p9 }
  0x3d   : > { %1885 = shalt.err (!%p1882_p2)
}
  0x3e   : > { %1731 = dma.hbm_to_vmem [thread:$0]  (!%p2120_p11), %s2520_s3, 1024, %s2124_s14, [#allocation6], %s2023_s13, %s2023_s13, %s2024_s15  }
  0x3f   : > { %s1886_s20 = scalar_lea.hbm %s2522_s5, 1024 }
  0x40   : > { %p1887_p6 = scmp.ne.s32.totalorder %s2522_s5, %s1886_s20  ;;  %p1893_p5 = scmp.lt.u32.totalorder %s1886_s20, %s2522_s5 }
  0x42   : > { %p1889_p10 = pnand %p1887_p6, %p2136_p13 }
  0x44   : > { %p1890_p3 = pneg %p1889_p10 }
  0x46   : > { %p1895_p7 = pnand %p1893_p5, %p1890_p3 }
  0x48   : > { %1898 = shalt.err (!%p1895_p7)
}
  0x49   : > { %s1899_s11 = scalar_lea.vmem %s253_s16, 1024  ;;  %p1907_p1 = scmp.lt.s32.totalorder %s253_s16, %s253_s16 }
  0x4a   : > { %p1900_p9 = scmp.ne.s32.totalorder %s253_s16, %s1899_s11  ;;  %p1908_p2 = scmp.lt.s32.totalorder %s1899_s11, %s1899_s11 }
  0x4c   : > { %p1902_p12 = pnand %p1900_p9, %p2136_p13  ;;  %p1909_p4 = por %p1908_p2, %p1907_p1 }
  0x4e   : > { %p1903_p0 = pneg %p1902_p12 }
  0x50   : > { %p1910_p8 = pnand %p1909_p4, %p1903_p0 }
  0x52   : > { %1913 = shalt.err (!%p1910_p8)
}
  0x53   : > { %1734 = dma.hbm_to_vmem [thread:$0]  (!%p2120_p11), %s2522_s5, 1024, %s253_s16, [#allocation9], %s2023_s13, %s2023_s13, %s2024_s15  }
  0x54   : > { %s2209_s22 = sadd.s32 1, %s2018_s27   ;;  %s32_s17 = sadd.s32 1, %s2014_s26 }
  0x55   : > { %s29_s12 = ssub.s32 %s2018_s27, %s2209_s22  ;;  %p39_p8 = scmp.ne.s32.totalorder %s2014_s26, %s2010_s25 }
  0x56   : > { %p30_p4 = scmp.eq.s32.totalorder %s29_s12, 0  ;;  %p40_p13 = scmp.eq.s32.totalorder %s2018_s27, 0 }
  0x57   : > { %p1746_p6 = scmp.lt.s32.totalorder %s2018_s27, 2  ;;  %p2535_p3 = scmp.eq.s32.totalorder %s2090_s28, 1 }
  0x58   : > { %s2219_s18 = scalar_select %p30_p4, %s2014_s26, %s32_s17  }
  0x59   : > { %p41_p10 = por %p40_p13, %p39_p8  ;;  %p2223_p5 = por %p2535_p3, %p39_p8 }
  0x5a   : > { %s269_s20 = sand.u32 1, %s2014_s26   ;;  %s1475_s21 = sshll.u32 %s2018_s27, 11 }
  0x5b   : > { %s1418_s16 = sshll.u32 %s269_s20, 7  ;;  %s2232_s10 = scalar_lea.hbm %s2517_s0, %s1475_s21 }
  0x5c   : > { %s273_s11 = scalar_lea.vmem [#allocation2], %s1418_s16  ;;  %p2234_p11 = pnand %p1746_p6, %p41_p10 }
  0x5d   : > { %s280_s14 = sshll.u32 %s273_s11, 4  ;;  %s2240_s12 = scalar_lea.sflag [#allocation3], %s269_s20  ;;  %s2238_s14 = int_to_ptr.vmem [resolvable:$true] %s280_s14 }
  0x5e   : > { %s1914_s17 = scalar_lea.hbm %s2232_s10, 2048  ;;  %p1916_p9 = pneg %p2234_p11 }
  0x5f   : > { %p1915_p7 = scmp.ne.s32.totalorder %s2232_s10, %s1914_s17  ;;  %s1919_s23 = scalar_lea.hbm %s2517_s0, 4096 }
  0x60   : > { %p1920_p1 = scmp.lt.u32.totalorder %s2232_s10, %s2517_s0  ;;  %p1921_p2 = scmp.lt.u32.totalorder %s1919_s23, %s1914_s17 }
  0x61   : > { %p1917_p12 = pnand %p1916_p9, %p1915_p7  ;;  %p1923_p8 = scmp.lt.u32.totalorder %s1914_s17, %s2232_s10 }
  0x62   : > { %p1922_p4 = por %p1921_p2, %p1920_p1 }
  0x63   : > { %p1918_p0 = pneg %p1917_p12 }
  0x64   : > { %p1924_p13 = por %p1923_p8, %p1922_p4 }
  0x66   : > { %p1925_p6 = pnand %p1924_p13, %p1918_p0 }
  0x68   : > { %1928 = shalt.err (!%p1925_p6)
}
  0x69   : > { %s1929_s20 = scalar_lea.vmem %s2238_s14, 2048  ;;  %s2025_s21 = smov [#allocation2]  }
  0x6a   : > { %p1930_p10 = scmp.ne.s32.totalorder %s2238_s14, %s1929_s20  ;;  %s1934_s16 = sshll.u32 %s2025_s21, 4  ;;  %s1935_s16 = int_to_ptr.vmem [resolvable:$false] %s1934_s16 }
  0x6b   : > { %s1936_s29 = scalar_lea.vmem %s1935_s16, 4096  ;;  %p1937_p12 = scmp.lt.s32.totalorder %s2238_s14, %s1935_s16 }
  0x6c   : > { %p1932_p3 = pnand %p1930_p10, %p1916_p9  ;;  %p1938_p1 = scmp.lt.s32.totalorder %s1936_s29, %s1929_s20 }
  0x6e   : > { %p1933_p7 = pneg %p1932_p3  ;;  %p1939_p2 = por %p1938_p1, %p1937_p12 }
  0x70   : > { %p1940_p4 = pnand %p1939_p2, %p1933_p7 }
  0x72   : > { %1943 = shalt.err (!%p1940_p4)
}
  0x73   : > { %1738 = dma.hbm_to_vmem [thread:$0]  (!%p2234_p11), %s2232_s10, 2048, %s2238_s14, %s2240_s12, %s2023_s13, %s2023_s13, %s2024_s15  }
  0x74   : > { %p2538_p9 = scmp.ne.s32.totalorder %s2532_s9, 0 }
  0x75   : > { %s2274_s17 = sand.u32 (!%p2538_p9), 1, %s2010_s25   ;;  %p2539_p0 = scmp.ne.s32.totalorder (!%p2538_p9), %s2529_s30, 0 }
  0x76   : > { %292 = sbr.rel (%p2538_p9) target bundleno = 898 (0x382), region = 48  ;;  %s1422_s23 = sshll.u32 (!%p2538_p9), %s2274_s17, 7 }
  0x77   : > { %s295_s11 = scalar_lea.sflag (!%p2538_p9), [#allocation3], %s2274_s17  ;;  %s2278_s20 = scalar_lea.vmem (!%p2538_p9), [#allocation2], %s1422_s23 }
  0x7d   : > { %1989 = dma.done.wait (%p2539_p0), %s295_s11, 2048  }
  0x7e   : > { %1991 = vsyncadd (%p2539_p0), %s295_s11, 4294965248  ;;  %p2540_p11 = scmp.eq.s32.totalorder %s2090_s28, 0 }
  0x80   : > { %1993 = dma.done.wait (%p2540_p11), [#allocation6], 2048   ;;  %p2541_p8 = pmov %p2540_p11 }
  0x82   : > { %1995 = vsyncadd (%p2541_p8), [#allocation6], 4294965248  ;;  %p2542_p13 = pmov %p2541_p8 }
  0x83   : > { %p2543_p6 = pmov %p2541_p8 }
  0x84   : > { %1997 = dma.done.wait (%p2542_p13), [#allocation9], 1024  }
  0x85   : > { %1999 = vsyncadd (%p2543_p6), [#allocation9], 4294966272  ;;  %v1790_v0 = vld [vmem:[#allocation5] sm:$0xff]   ;;  %v1791_v1 = vld [vmem:[#allocation5 + $0x8] sm:$0xff]   ;;  %s1426_s10 = sshll.u32 %s2274_s17, 8  ;;  %s1476_s21 = sshll.u32 %s2090_s28, 12 }
  0x86   : > { %1549 = vmatprep.subr.bf16.mxu0 %v1790_v0  ;;  %1693 = vmatprep.subr.bf16.mxu1 %v1790_v0  ;;  %v1792_v2 = vld [vmem:[#allocation5 + $0x10] sm:$0xff]   ;;  %v1793_v3 = vld [vmem:[#allocation5 + $0x18] sm:$0xff]   ;;  %v1798_v4 = vld [vmem:[%s2278_s20] sm:$0xff]   ;;  %s2402_s12 = scalar_lea.vmem [#allocation10], %s1426_s10  ;;  %s2467_s11 = scalar_lea.hbm %s2524_s7, %s1476_s21 }
  0x87   : > { %1550 = vmatpush3.bf16.msra.mxu0 %v1790_v0  ;;  %1701 = vmatpush3.bf16.msra.mxu1 %v1790_v0  ;;  %v1794_v5 = vld [vmem:[#allocation5 + $0x20] sm:$0xff]   ;;  %v1795_v6 = vld [vmem:[#allocation5 + $0x28] sm:$0xff]   ;;  %v1796_v8 = vld [vmem:[#allocation5 + $0x30] sm:$0xff]   ;;  %s1310_s16 = sshll.u32 %s2402_s12, 4  ;;  %s1297_s28 = scalar_lea.sflag [#allocation4], %s2274_s17  ;;  %s2469_s16 = int_to_ptr.vmem [resolvable:$true] %s1310_s16 }
  0x88   : > { %1551 = vmatprep.subr.bf16.mxu0 %v1791_v1  ;;  %1694 = vmatprep.subr.bf16.mxu1 %v1791_v1  ;;  %v1806_v7 = vld [vmem:[%s2278_s20 + $0x40] sm:$0xff]   ;;  %v1797_v9 = vld [vmem:[#allocation5 + $0x38] sm:$0xff]   ;;  %v1799_v10 = vld [vmem:[%s2278_s20 + $0x8] sm:$0xff]   ;;  %s2026_s30 = smov [#allocation10]  }
  0x89   : > { %1565 = vmatprep.mubr.bf16.mxu0 %v1798_v4  ;;  %1581 = vmatprep.mubr.bf16.mxu1 %v1806_v7  ;;  %v1807_v11 = vld [vmem:[%s2278_s20 + $0x48] sm:$0xff]   ;;  %v1814_v12 = vld [vmem:[#allocation7] sm:$0xff]   ;;  %v1800_v13 = vld [vmem:[%s2278_s20 + $0x10] sm:$0xff]   ;;  %s1948_s9 = sshll.u32 %s2026_s30, 4  ;;  %s1949_s9 = int_to_ptr.vmem [resolvable:$false] %s1948_s9 }
  0x8a   : > { %v1808_v14 = vld [vmem:[%s2278_s20 + $0x50] sm:$0xff]   ;;  %v1815_v15 = vld [vmem:[#allocation7 + $0x8] sm:$0xff]   ;;  %v1801_v17 = vld [vmem:[%s2278_s20 + $0x18] sm:$0xff]   ;;  %s1950_s13 = scalar_lea.vmem %s1949_s9, 8192  ;;  %p1951_p12 = scmp.lt.s32.totalorder %s2469_s16, %s1949_s9 }
  0x8b   : > { %1552 = vmatpush3.bf16.msra.mxu0 %v1791_v1  ;;  %1702 = vmatpush3.bf16.msra.mxu1 %v1791_v1  ;;  %v1816_v16 = vld [vmem:[#allocation7 + $0x10] sm:$0xff]   ;;  %v1809_v18 = vld [vmem:[%s2278_s20 + $0x58] sm:$0xff]   ;;  %v1802_v19 = vld [vmem:[%s2278_s20 + $0x20] sm:$0xff]  }
  0x8c   : > { %1553 = vmatprep.subr.bf16.mxu0 %v1792_v2  ;;  %1695 = vmatprep.subr.bf16.mxu1 %v1792_v2  ;;  %v1810_v20 = vld [vmem:[%s2278_s20 + $0x60] sm:$0xff]   ;;  %v1817_v21 = vld [vmem:[#allocation7 + $0x18] sm:$0xff]   ;;  %v1803_v23 = vld [vmem:[%s2278_s20 + $0x28] sm:$0xff]  }
  0x8d   : > { %v1818_v22 = vld [vmem:[#allocation7 + $0x20] sm:$0xff]   ;;  %v1811_v24 = vld [vmem:[%s2278_s20 + $0x68] sm:$0xff]   ;;  %v1804_v25 = vld [vmem:[%s2278_s20 + $0x30] sm:$0xff]  }
  0x8e   : > { %v1812_v26 = vld [vmem:[%s2278_s20 + $0x70] sm:$0xff]   ;;  %v1819_v27 = vld [vmem:[#allocation7 + $0x28] sm:$0xff]   ;;  %v1805_v28 = vld [vmem:[%s2278_s20 + $0x38] sm:$0xff]  }
  0x8f   : > { %1554 = vmatpush3.bf16.msra.mxu0 %v1792_v2  ;;  %1703 = vmatpush3.bf16.msra.mxu1 %v1792_v2  ;;  %v1813_v29 = vld [vmem:[%s2278_s20 + $0x78] sm:$0xff]   ;;  %v1820_v30 = vld [vmem:[#allocation7 + $0x30] sm:$0xff]   ;;  %v1822_v32 = vld [vmem:[#allocation8] sm:$0xff]   ;;  %s1944_s20 = scalar_lea.vmem %s2469_s16, 4096 }
  0x90   : > { %1555 = vmatprep.subr.bf16.mxu0 %v1793_v3  ;;  %1696 = vmatprep.subr.bf16.mxu1 %v1793_v3  ;;  %v1821_v31 = vld [vmem:[#allocation7 + $0x38] sm:$0xff]   ;;  %v1823_v33 = vld [vmem:[#allocation8 + $0x8] sm:$0xff]   ;;  %v1824_v34 = vld [vmem:[#allocation8 + $0x10] sm:$0xff]   ;;  %p1945_p10 = scmp.ne.s32.totalorder %s2469_s16, %s1944_s20  ;;  %p1952_p1 = scmp.lt.s32.totalorder %s1950_s13, %s1944_s20 }
  0x91   : > { %v1825_v35 = vld [vmem:[#allocation8 + $0x18] sm:$0xff]   ;;  %v1826_v36 = vld [vmem:[#allocation8 + $0x20] sm:$0xff]   ;;  %v1827_v37 = vld [vmem:[#allocation8 + $0x28] sm:$0xff]  }
  0x92   : > { %v2311_v38 = vld [vmem:[%s2519_s2] ss:$0 sm:$0xff]  ;;  %p1946_p3 = pnand %p1945_p10, %p2223_p5  ;;  %p1953_p2 = por %p1952_p1, %p1951_p12 }
  0x93   : > { %1556 = vmatpush3.bf16.msra.mxu0 %v1793_v3  ;;  %1704 = vmatpush3.bf16.msra.mxu1 %v1793_v3 }
  0x94   : > { %1557 = vmatprep.subr.bf16.mxu0 %v1794_v5  ;;  %1697 = vmatprep.subr.bf16.mxu1 %v1794_v5  ;;  %p1947_p7 = pneg %p1946_p3 }
  0x96   : > { %p1954_p4 = pnand %p1953_p2, %p1947_p7 }
  0x97   : > { %1558 = vmatpush3.bf16.msra.mxu0 %v1794_v5  ;;  %1705 = vmatpush3.bf16.msra.mxu1 %v1794_v5 }
  0x98   : > { %1559 = vmatprep.subr.bf16.mxu0 %v1795_v6  ;;  %1698 = vmatprep.subr.bf16.mxu1 %v1795_v6 }
  0x9b   : > { %1560 = vmatpush3.bf16.msra.mxu0 %v1795_v6  ;;  %1706 = vmatpush3.bf16.msra.mxu1 %v1795_v6 }
  0x9c   : > { %1561 = vmatprep.subr.bf16.mxu0 %v1796_v8  ;;  %1699 = vmatprep.subr.bf16.mxu1 %v1796_v8 }
  0x9f   : > { %1562 = vmatpush3.bf16.msra.mxu0 %v1796_v8  ;;  %1707 = vmatpush3.bf16.msra.mxu1 %v1796_v8 }
  0xa0   : > { %1563 = vmatprep.subr.bf16.mxu0 %v1797_v9  ;;  %1700 = vmatprep.subr.bf16.mxu1 %v1797_v9 }
  0xa3   : > { %1564 = vmatpush3.bf16.msra.mxu0 %v1797_v9  ;;  %1708 = vmatpush3.bf16.msra.mxu1 %v1797_v9 }
  0xa4   : > { %1597 = vmatprep.subr.bf16.mxu1 %v1814_v12  ;;  %1645 = vmatprep.subr.bf16.mxu0 %v1822_v32 }
  0xa6   : > { %1566 = vmatmul.mubr.bf16.vlgmr.msra.gmra.mrb[0].mxu0 %v1799_v10  ;;  %1582 = vmatmul.mubr.bf16.vlgmr.msra.gmra.mrb[0].mxu1 %v1807_v11 }
  0xa7   : > { %1569 = vmatprep.mubr.bf16.mxu0 %v1800_v13  ;;  %1585 = vmatprep.mubr.bf16.mxu1 %v1808_v14 }
  0xa8   : > { %1598 = vmatpush3.bf16.msra.mxu1 %v1814_v12  ;;  %1646 = vmatpush3.bf16.msra.mxu0 %v1822_v32 }
  0xa9   : > { %1599 = vmatprep.subr.bf16.mxu1 %v1815_v15  ;;  %1647 = vmatprep.subr.bf16.mxu0 %v1823_v33 }
  0xac   : > { %1600 = vmatpush3.bf16.msra.mxu1 %v1815_v15  ;;  %1648 = vmatpush3.bf16.msra.mxu0 %v1823_v33 }
  0xad   : > { %1601 = vmatprep.subr.bf16.mxu1 %v1816_v16  ;;  %1649 = vmatprep.subr.bf16.mxu0 %v1824_v34 }
  0xae   : > { %1570 = vmatmul.mubr.bf16.gmra.mrb[4].mxu0 %v1801_v17  ;;  %1586 = vmatmul.mubr.bf16.gmra.mrb[4].mxu1 %v1809_v18 }
  0xaf   : > { %1573 = vmatprep.mubr.bf16.mxu0 %v1802_v19  ;;  %1589 = vmatprep.mubr.bf16.mxu1 %v1810_v20 }
  0xb0   : > { %1602 = vmatpush3.bf16.msra.mxu1 %v1816_v16  ;;  %1650 = vmatpush3.bf16.msra.mxu0 %v1824_v34 }
  0xb1   : > { %1603 = vmatprep.subr.bf16.mxu1 %v1817_v21  ;;  %1651 = vmatprep.subr.bf16.mxu0 %v1825_v35 }
  0xb4   : > { %1604 = vmatpush3.bf16.msra.mxu1 %v1817_v21  ;;  %1652 = vmatpush3.bf16.msra.mxu0 %v1825_v35 }
  0xb5   : > { %1605 = vmatprep.subr.bf16.mxu1 %v1818_v22  ;;  %1653 = vmatprep.subr.bf16.mxu0 %v1826_v36 }
  0xb6   : > { %1574 = vmatmul.mubr.bf16.gmra.mrb[8].mxu0 %v1803_v23  ;;  %1590 = vmatmul.mubr.bf16.gmra.mrb[8].mxu1 %v1811_v24 }
  0xb7   : > { %1577 = vmatprep.mubr.bf16.mxu0 %v1804_v25  ;;  %1593 = vmatprep.mubr.bf16.mxu1 %v1812_v26 }
  0xb8   : > { %1606 = vmatpush3.bf16.msra.mxu1 %v1818_v22  ;;  %1654 = vmatpush3.bf16.msra.mxu0 %v1826_v36 }
  0xb9   : > { %1607 = vmatprep.subr.bf16.mxu1 %v1819_v27  ;;  %1655 = vmatprep.subr.bf16.mxu0 %v1827_v37 }
  0xbc   : > { %1608 = vmatpush3.bf16.msra.mxu1 %v1819_v27  ;;  %1656 = vmatpush3.bf16.msra.mxu0 %v1827_v37 }
  0xbd   : > { %1609 = vmatprep.subr.bf16.mxu1 %v1820_v30 }
  0xbe   : > { %1578 = vmatmul.mubr.bf16.gmra.mrb[12].mxu0 %v1805_v28  ;;  %1594 = vmatmul.mubr.bf16.gmra.mrb[12].mxu1 %v1813_v29 }
  0xc0   : > { %1610 = vmatpush3.bf16.msra.mxu1 %v1820_v30 }
  0xc1   : > { %1611 = vmatprep.subr.bf16.mxu1 %v1821_v31 }
  0xc4   : > { %1612 = vmatpush3.bf16.msra.mxu1 %v1821_v31 }
 0x179   : > { %v1567_v39 = vpop.f32.mrb[0].mxu0  ;;  %v1583_v40 = vpop.f32.mrb[0].mxu1 }
 0x17a   : > { %v586_v41 = vadd.f32 %v1567_v39, %v2311_v38  ;;  %v577_v42 = vpop.f32.mrb[1].mxu0  ;;  %v650_v43 = vadd.f32 %v1583_v40, %v2311_v38  ;;  %v641_v44 = vpop.f32.mrb[1].mxu1 }
 0x17b   : > { %v578_v45 = vadd.f32 %v2311_v38, %v577_v42  ;;  %v1568_v46 = vpop.f32.mrb[2].mxu0  ;;  %v642_v47 = vadd.f32 %v2311_v38, %v641_v44  ;;  %v1584_v48 = vpop.f32.mrb[2].mxu1 }
 0x17c   : > { %v589_v49 = vadd.f32 %v1568_v46, %v2311_v38  ;;  %v580_v50 = vpop.f32.mrb[3].mxu0  ;;  %v722_v51 = vmax.f32 %v650_v43, 0.0  ;;  %v653_v52 = vadd.f32 %v1584_v48, %v2311_v38  ;;  %v644_v53 = vpop.f32.mrb[3].mxu1  ;;  %v706_v57 = vmax.f32 %v586_v41, 0.0 }
 0x17d   : > { %v581_v54 = vadd.f32 %v2311_v38, %v580_v50  ;;  %v720_v55 = vmax.f32 %v642_v47, 0.0  ;;  %v645_v56 = vadd.f32 %v2311_v38, %v644_v53  ;;  %v704_v60 = vmax.f32 %v578_v45, 0.0 }
 0x17e   : > { %v707_v58 = vmax.f32 %v589_v49, 0.0  ;;  %v723_v59 = vmax.f32 %v653_v52, 0.0 }
 0x17f   : > { %v705_v61 = vmax.f32 %v581_v54, 0.0  ;;  %v721_v62 = vmax.f32 %v645_v56, 0.0 }
 0x180   : > { %v737_v63 = vpack.c.bf16 %v707_v58, %v706_v57  ;;  %v2321_v0 = vpack.c.bf16 %v723_v59, %v722_v51 }
 0x181   : > { %v736_v1 = vpack.c.bf16 %v705_v61, %v704_v60  ;;  %v1571_v2 = vpop.f32.mrb[4].mxu0  ;;  %v2323_v3 = vpack.c.bf16 %v721_v62, %v720_v55  ;;  %v1587_v4 = vpop.f32.mrb[4].mxu1 }
 0x182   : > { %v602_v5 = vadd.f32 %v1571_v2, %v2311_v38  ;;  %v593_v6 = vpop.f32.mrb[5].mxu0  ;;  %v666_v7 = vadd.f32 %v1587_v4, %v2311_v38  ;;  %v657_v8 = vpop.f32.mrb[5].mxu1 }
 0x183   : > { %v594_v9 = vadd.f32 %v2311_v38, %v593_v6  ;;  %v1572_v10 = vpop.f32.mrb[6].mxu0  ;;  %1613 = vmatprep.mubr.bf16.mxu1 %v736_v1  ;;  %v658_v11 = vadd.f32 %v2311_v38, %v657_v8  ;;  %v1588_v12 = vpop.f32.mrb[6].mxu1 }
 0x184   : > { %v605_v13 = vadd.f32 %v1572_v10, %v2311_v38  ;;  %v596_v14 = vpop.f32.mrb[7].mxu0  ;;  %1614 = vmatmul.mubr.bf16.vlgmr.msra.gmra.mrb[16].mxu1 %v737_v63  ;;  %v726_v15 = vmax.f32 %v666_v7, 0.0  ;;  %v669_v16 = vadd.f32 %v1588_v12, %v2311_v38  ;;  %v660_v17 = vpop.f32.mrb[7].mxu1  ;;  %v710_v21 = vmax.f32 %v602_v5, 0.0 }
 0x185   : > { %v597_v18 = vadd.f32 %v2311_v38, %v596_v14  ;;  %v724_v19 = vmax.f32 %v658_v11, 0.0  ;;  %v661_v20 = vadd.f32 %v2311_v38, %v660_v17  ;;  %v708_v24 = vmax.f32 %v594_v9, 0.0 }
 0x186   : > { %v711_v22 = vmax.f32 %v605_v13, 0.0  ;;  %v727_v23 = vmax.f32 %v669_v16, 0.0 }
 0x187   : > { %v709_v25 = vmax.f32 %v597_v18, 0.0  ;;  %v725_v26 = vmax.f32 %v661_v20, 0.0 }
 0x188   : > { %v739_v27 = vpack.c.bf16 %v711_v22, %v710_v21  ;;  %v2333_v28 = vpack.c.bf16 %v727_v23, %v726_v15 }
 0x189   : > { %v738_v29 = vpack.c.bf16 %v709_v25, %v708_v24  ;;  %v1575_v30 = vpop.f32.mrb[8].mxu0  ;;  %v2335_v31 = vpack.c.bf16 %v725_v26, %v724_v19  ;;  %v1591_v32 = vpop.f32.mrb[8].mxu1  ;;  %v1829_v26 = vld [vmem:[#allocation8 + $0x38] sm:$0xff]  }
 0x18a   : > { %v618_v33 = vadd.f32 %v1575_v30, %v2311_v38  ;;  %v609_v34 = vpop.f32.mrb[9].mxu0  ;;  %v682_v35 = vadd.f32 %v1591_v32, %v2311_v38  ;;  %v673_v36 = vpop.f32.mrb[9].mxu1 }
 0x18b   : > { %v610_v37 = vadd.f32 %v2311_v38, %v609_v34  ;;  %v1576_v39 = vpop.f32.mrb[10].mxu0  ;;  %1617 = vmatprep.mubr.bf16.mxu1 %v738_v29  ;;  %v674_v40 = vadd.f32 %v2311_v38, %v673_v36  ;;  %v1592_v41 = vpop.f32.mrb[10].mxu1 }
 0x18c   : > { %v621_v42 = vadd.f32 %v1576_v39, %v2311_v38  ;;  %v612_v43 = vpop.f32.mrb[11].mxu0  ;;  %1618 = vmatmul.mubr.bf16.gmra.mrb[20].mxu1 %v739_v27  ;;  %v730_v44 = vmax.f32 %v682_v35, 0.0  ;;  %v685_v45 = vadd.f32 %v1592_v41, %v2311_v38  ;;  %v676_v46 = vpop.f32.mrb[11].mxu1  ;;  %v714_v50 = vmax.f32 %v618_v33, 0.0 }
 0x18d   : > { %v613_v47 = vadd.f32 %v2311_v38, %v612_v43  ;;  %v728_v48 = vmax.f32 %v674_v40, 0.0  ;;  %v677_v49 = vadd.f32 %v2311_v38, %v676_v46  ;;  %v712_v53 = vmax.f32 %v610_v37, 0.0 }
 0x18e   : > { %v715_v51 = vmax.f32 %v621_v42, 0.0  ;;  %v731_v52 = vmax.f32 %v685_v45, 0.0 }
 0x18f   : > { %v713_v54 = vmax.f32 %v613_v47, 0.0  ;;  %v729_v55 = vmax.f32 %v677_v49, 0.0 }
 0x190   : > { %v741_v56 = vpack.c.bf16 %v715_v51, %v714_v50  ;;  %v749_v57 = vpack.c.bf16 %v731_v52, %v730_v44 }
 0x191   : > { %v740_v58 = vpack.c.bf16 %v713_v54, %v712_v53  ;;  %v1579_v59 = vpop.f32.mrb[12].mxu0  ;;  %v748_v60 = vpack.c.bf16 %v729_v55, %v728_v48  ;;  %v1595_v61 = vpop.f32.mrb[12].mxu1 }
 0x192   : > { %v634_v62 = vadd.f32 %v1579_v59, %v2311_v38  ;;  %v625_v63 = vpop.f32.mrb[13].mxu0  ;;  %v698_v1 = vadd.f32 %v1595_v61, %v2311_v38  ;;  %v689_v2 = vpop.f32.mrb[13].mxu1 }
 0x193   : > { %v626_v4 = vadd.f32 %v2311_v38, %v625_v63  ;;  %v1580_v5 = vpop.f32.mrb[14].mxu0  ;;  %1621 = vmatprep.mubr.bf16.mxu1 %v740_v58  ;;  %v690_v6 = vadd.f32 %v2311_v38, %v689_v2  ;;  %v1596_v7 = vpop.f32.mrb[14].mxu1 }
 0x194   : > { %v637_v8 = vadd.f32 %v1580_v5, %v2311_v38  ;;  %v628_v9 = vpop.f32.mrb[15].mxu0  ;;  %1622 = vmatmul.mubr.bf16.gmra.mrb[24].mxu1 %v741_v56  ;;  %v734_v10 = vmax.f32 %v698_v1, 0.0  ;;  %v701_v11 = vadd.f32 %v1596_v7, %v2311_v38  ;;  %v692_v12 = vpop.f32.mrb[15].mxu1  ;;  %v718_v16 = vmax.f32 %v634_v62, 0.0 }
 0x195   : > { %v629_v13 = vadd.f32 %v2311_v38, %v628_v9  ;;  %v732_v14 = vmax.f32 %v690_v6, 0.0  ;;  %v693_v15 = vadd.f32 %v2311_v38, %v692_v12  ;;  %v716_v19 = vmax.f32 %v626_v4, 0.0  ;;  %v1828_v38 = vld [vmem:[#allocation8 + $0x30] sm:$0xff]  }
 0x196   : > { %v719_v17 = vmax.f32 %v637_v8, 0.0  ;;  %v735_v18 = vmax.f32 %v701_v11, 0.0  ;;  %1657 = vmatprep.subr.bf16.mxu0 %v1828_v38 }
 0x197   : > { %v717_v20 = vmax.f32 %v629_v13, 0.0  ;;  %v733_v21 = vmax.f32 %v693_v15, 0.0  ;;  %1658 = vmatpush3.bf16.msra.mxu0 %v1828_v38 }
 0x198   : > { %v743_v22 = vpack.c.bf16 %v719_v17, %v718_v16  ;;  %v751_v23 = vpack.c.bf16 %v735_v18, %v734_v10  ;;  %1659 = vmatprep.subr.bf16.mxu0 %v1829_v26 }
 0x199   : > { %v742_v24 = vpack.c.bf16 %v717_v20, %v716_v19  ;;  %v750_v25 = vpack.c.bf16 %v733_v21, %v732_v14 }
 0x19b   : > { %1625 = vmatprep.mubr.bf16.mxu1 %v742_v24  ;;  %1660 = vmatpush3.bf16.msra.mxu0 %v1829_v26 }
 0x19c   : > { %1626 = vmatmul.mubr.bf16.gmra.mrb[28].mxu1 %v743_v22 }
 0x19d   : > { %1629 = vmatprep.mubr.bf16.mxu1 %v2323_v3  ;;  %v2360_v3 = vld [vmem:[%s2521_s4] ss:$0 sm:$0xff] }
 0x1a4   : > { %1630 = vmatmul.mubr.bf16.gmra.mrb[32].mxu1 %v2321_v0 }
 0x1a5   : > { %1633 = vmatprep.mubr.bf16.mxu1 %v2335_v31 }
 0x1ac   : > { %1634 = vmatmul.mubr.bf16.gmra.mrb[36].mxu1 %v2333_v28 }
 0x1ad   : > { %1637 = vmatprep.mubr.bf16.mxu1 %v748_v60 }
 0x1b4   : > { %1638 = vmatmul.mubr.bf16.gmra.mrb[40].mxu1 %v749_v57 }
 0x1b5   : > { %1641 = vmatprep.mubr.bf16.mxu1 %v750_v25 }
 0x1bc   : > { %1642 = vmatmul.mubr.bf16.gmra.mrb[44].mxu1 %v751_v23 }
 0x257   : > { %v1615_v0 = vpop.f32.mrb[16].mxu1 }
 0x258   : > { %v866_v27 = vadd.f32 %v1615_v0, %v2360_v3  ;;  %v857_v29 = vpop.f32.mrb[17].mxu1 }
 0x259   : > { %v858_v28 = vadd.f32 %v2360_v3, %v857_v29  ;;  %v1616_v30 = vpop.f32.mrb[18].mxu1 }
 0x25a   : > { %v869_v31 = vadd.f32 %v1616_v30, %v2360_v3  ;;  %v860_v32 = vpop.f32.mrb[19].mxu1  ;;  %v986_v34 = vmax.f32 %v866_v27, 0.0 }
 0x25b   : > { %v861_v33 = vadd.f32 %v2360_v3, %v860_v32  ;;  %v984_v36 = vmax.f32 %v858_v28, 0.0 }
 0x25c   : > { %v987_v35 = vmax.f32 %v869_v31, 0.0 }
 0x25d   : > { %v985_v37 = vmax.f32 %v861_v33, 0.0 }
 0x25e   : > { %v1017_v39 = vpack.c.bf16 %v987_v35, %v986_v34 }
 0x25f   : > { %v1016_v40 = vpack.c.bf16 %v985_v37, %v984_v36  ;;  %v1619_v41 = vpop.f32.mrb[20].mxu1 }
 0x260   : > { %v882_v42 = vadd.f32 %v1619_v41, %v2360_v3  ;;  %v873_v43 = vpop.f32.mrb[21].mxu1 }
 0x261   : > { %v874_v44 = vadd.f32 %v2360_v3, %v873_v43  ;;  %v1620_v45 = vpop.f32.mrb[22].mxu1  ;;  %1661 = vmatprep.mubr.bf16.mxu0 %v1016_v40 }
 0x262   : > { %v885_v46 = vadd.f32 %v1620_v45, %v2360_v3  ;;  %v876_v47 = vpop.f32.mrb[23].mxu1  ;;  %1662 = vmatmul.mubr.bf16.vlgmr.msra.gmra.mrb[16].mxu0 %v1017_v39  ;;  %v990_v49 = vmax.f32 %v882_v42, 0.0 }
 0x263   : > { %v877_v48 = vadd.f32 %v2360_v3, %v876_v47  ;;  %v988_v51 = vmax.f32 %v874_v44, 0.0 }
 0x264   : > { %v991_v50 = vmax.f32 %v885_v46, 0.0 }
 0x265   : > { %v989_v52 = vmax.f32 %v877_v48, 0.0 }
 0x266   : > { %v1019_v53 = vpack.c.bf16 %v991_v50, %v990_v49 }
 0x267   : > { %v1018_v54 = vpack.c.bf16 %v989_v52, %v988_v51  ;;  %v1623_v55 = vpop.f32.mrb[24].mxu1 }
 0x268   : > { %v898_v56 = vadd.f32 %v1623_v55, %v2360_v3  ;;  %v889_v57 = vpop.f32.mrb[25].mxu1 }
 0x269   : > { %v890_v58 = vadd.f32 %v2360_v3, %v889_v57  ;;  %v1624_v59 = vpop.f32.mrb[26].mxu1  ;;  %1665 = vmatprep.mubr.bf16.mxu0 %v1018_v54 }
 0x26a   : > { %v901_v60 = vadd.f32 %v1624_v59, %v2360_v3  ;;  %v892_v61 = vpop.f32.mrb[27].mxu1  ;;  %1666 = vmatmul.mubr.bf16.gmra.mrb[20].mxu0 %v1019_v53  ;;  %v994_v63 = vmax.f32 %v898_v56, 0.0 }
 0x26b   : > { %v893_v62 = vadd.f32 %v2360_v3, %v892_v61  ;;  %v992_v2 = vmax.f32 %v890_v58, 0.0 }
 0x26c   : > { %v995_v1 = vmax.f32 %v901_v60, 0.0 }
 0x26d   : > { %v993_v4 = vmax.f32 %v893_v62, 0.0 }
 0x26e   : > { %v1021_v5 = vpack.c.bf16 %v995_v1, %v994_v63 }
 0x26f   : > { %v1020_v6 = vpack.c.bf16 %v993_v4, %v992_v2  ;;  %v1627_v7 = vpop.f32.mrb[28].mxu1 }
 0x270   : > { %v914_v8 = vadd.f32 %v1627_v7, %v2360_v3  ;;  %v905_v9 = vpop.f32.mrb[29].mxu1 }
 0x271   : > { %v906_v10 = vadd.f32 %v2360_v3, %v905_v9  ;;  %v1628_v11 = vpop.f32.mrb[30].mxu1  ;;  %1669 = vmatprep.mubr.bf16.mxu0 %v1020_v6 }
 0x272   : > { %v917_v12 = vadd.f32 %v1628_v11, %v2360_v3  ;;  %v908_v13 = vpop.f32.mrb[31].mxu1  ;;  %1670 = vmatmul.mubr.bf16.gmra.mrb[24].mxu0 %v1021_v5  ;;  %v998_v15 = vmax.f32 %v914_v8, 0.0 }
 0x273   : > { %v909_v14 = vadd.f32 %v2360_v3, %v908_v13  ;;  %v996_v17 = vmax.f32 %v906_v10, 0.0 }
 0x274   : > { %v999_v16 = vmax.f32 %v917_v12, 0.0 }
 0x275   : > { %v997_v18 = vmax.f32 %v909_v14, 0.0  ;;  %v2398_v14 = vld [vmem:[%s2523_s6] ss:$0 sm:$0xff] }
 0x276   : > { %v1023_v19 = vpack.c.bf16 %v999_v16, %v998_v15 }
 0x277   : > { %v1022_v20 = vpack.c.bf16 %v997_v18, %v996_v17  ;;  %v1631_v21 = vpop.f32.mrb[32].mxu1 }
 0x278   : > { %v930_v22 = vadd.f32 %v1631_v21, %v2360_v3  ;;  %v921_v23 = vpop.f32.mrb[33].mxu1 }
 0x279   : > { %v922_v24 = vadd.f32 %v2360_v3, %v921_v23  ;;  %v1632_v25 = vpop.f32.mrb[34].mxu1  ;;  %1673 = vmatprep.mubr.bf16.mxu0 %v1022_v20 }
 0x27a   : > { %v933_v38 = vadd.f32 %v1632_v25, %v2360_v3  ;;  %v924_v26 = vpop.f32.mrb[35].mxu1  ;;  %1674 = vmatmul.mubr.bf16.gmra.mrb[28].mxu0 %v1023_v19  ;;  %v1002_v27 = vmax.f32 %v930_v22, 0.0 }
 0x27b   : > { %v925_v0 = vadd.f32 %v2360_v3, %v924_v26  ;;  %v1000_v28 = vmax.f32 %v922_v24, 0.0 }
 0x27c   : > { %v1003_v29 = vmax.f32 %v933_v38, 0.0 }
 0x27d   : > { %v1001_v30 = vmax.f32 %v925_v0, 0.0 }
 0x27e   : > { %v1025_v31 = vpack.c.bf16 %v1003_v29, %v1002_v27 }
 0x27f   : > { %v1024_v32 = vpack.c.bf16 %v1001_v30, %v1000_v28  ;;  %v1635_v33 = vpop.f32.mrb[36].mxu1 }
 0x280   : > { %v946_v34 = vadd.f32 %v1635_v33, %v2360_v3  ;;  %v937_v35 = vpop.f32.mrb[37].mxu1 }
 0x281   : > { %v938_v36 = vadd.f32 %v2360_v3, %v937_v35  ;;  %v1636_v37 = vpop.f32.mrb[38].mxu1  ;;  %1677 = vmatprep.mubr.bf16.mxu0 %v1024_v32 }
 0x282   : > { %v949_v39 = vadd.f32 %v1636_v37, %v2360_v3  ;;  %v940_v40 = vpop.f32.mrb[39].mxu1  ;;  %1678 = vmatmul.mubr.bf16.gmra.mrb[32].mxu0 %v1025_v31  ;;  %v1006_v42 = vmax.f32 %v946_v34, 0.0 }
 0x283   : > { %v941_v41 = vadd.f32 %v2360_v3, %v940_v40  ;;  %v1004_v44 = vmax.f32 %v938_v36, 0.0 }
 0x284   : > { %v1007_v43 = vmax.f32 %v949_v39, 0.0 }
 0x285   : > { %v1005_v45 = vmax.f32 %v941_v41, 0.0 }
 0x286   : > { %v1027_v46 = vpack.c.bf16 %v1007_v43, %v1006_v42 }
 0x287   : > { %v1026_v47 = vpack.c.bf16 %v1005_v45, %v1004_v44  ;;  %v1639_v48 = vpop.f32.mrb[40].mxu1 }
 0x288   : > { %v962_v49 = vadd.f32 %v1639_v48, %v2360_v3  ;;  %v953_v50 = vpop.f32.mrb[41].mxu1 }
 0x289   : > { %v954_v51 = vadd.f32 %v2360_v3, %v953_v50  ;;  %v1640_v52 = vpop.f32.mrb[42].mxu1  ;;  %1681 = vmatprep.mubr.bf16.mxu0 %v1026_v47 }
 0x28a   : > { %v965_v53 = vadd.f32 %v1640_v52, %v2360_v3  ;;  %v956_v54 = vpop.f32.mrb[43].mxu1  ;;  %1682 = vmatmul.mubr.bf16.gmra.mrb[36].mxu0 %v1027_v46  ;;  %v1010_v56 = vmax.f32 %v962_v49, 0.0 }
 0x28b   : > { %v957_v55 = vadd.f32 %v2360_v3, %v956_v54  ;;  %v1008_v58 = vmax.f32 %v954_v51, 0.0 }
 0x28c   : > { %v1011_v57 = vmax.f32 %v965_v53, 0.0 }
 0x28d   : > { %v1009_v59 = vmax.f32 %v957_v55, 0.0 }
 0x28e   : > { %v1029_v60 = vpack.c.bf16 %v1011_v57, %v1010_v56 }
 0x28f   : > { %v1028_v61 = vpack.c.bf16 %v1009_v59, %v1008_v58  ;;  %v1643_v62 = vpop.f32.mrb[44].mxu1 }
 0x290   : > { %v978_v63 = vadd.f32 %v1643_v62, %v2360_v3  ;;  %v969_v1 = vpop.f32.mrb[45].mxu1 }
 0x291   : > { %v970_v2 = vadd.f32 %v2360_v3, %v969_v1  ;;  %v1644_v4 = vpop.f32.mrb[46].mxu1  ;;  %1685 = vmatprep.mubr.bf16.mxu0 %v1028_v61 }
 0x292   : > { %v981_v5 = vadd.f32 %v1644_v4, %v2360_v3  ;;  %v972_v6 = vpop.f32.mrb[47].mxu1  ;;  %1686 = vmatmul.mubr.bf16.gmra.mrb[40].mxu0 %v1029_v60  ;;  %v1014_v8 = vmax.f32 %v978_v63, 0.0 }
 0x293   : > { %v973_v7 = vadd.f32 %v2360_v3, %v972_v6  ;;  %v1012_v10 = vmax.f32 %v970_v2, 0.0 }
 0x294   : > { %v1015_v9 = vmax.f32 %v981_v5, 0.0 }
 0x295   : > { %v1013_v11 = vmax.f32 %v973_v7, 0.0 }
 0x296   : > { %v1031_v12 = vpack.c.bf16 %v1015_v9, %v1014_v8 }
 0x297   : > { %v1030_v13 = vpack.c.bf16 %v1013_v11, %v1012_v10 }
 0x299   : > { %1689 = vmatprep.mubr.bf16.mxu0 %v1030_v13 }
 0x29a   : > { %1690 = vmatmul.mubr.bf16.gmra.mrb[44].mxu0 %v1031_v12 }
 0x335   : > { %v1663_v15 = vpop.f32.mrb[16].mxu0 }
 0x336   : > { %v1146_v16 = vadd.f32 %v1663_v15, %v2398_v14  ;;  %v1137_v17 = vpop.f32.mrb[17].mxu0 }
 0x337   : > { %v1138_v3 = vadd.f32 %v2398_v14, %v1137_v17  ;;  %v1664_v18 = vpop.f32.mrb[18].mxu0 }
 0x338   : > { %1266 = vst [vmem:[%s2402_s12 + $0x10] sm:$0xff] %v1146_v16  ;;  %v1149_v19 = vadd.f32 %v1664_v18, %v2398_v14  ;;  %v1140_v20 = vpop.f32.mrb[19].mxu0 }
 0x339   : > { %1264 = vst [vmem:[%s2402_s12] sm:$0xff] %v1138_v3  ;;  %v1141_v21 = vadd.f32 %v2398_v14, %v1140_v20 }
 0x33a   : > { %1267 = vst [vmem:[%s2402_s12 + $0x18] sm:$0xff] %v1149_v19 }
 0x33b   : > { %1265 = vst [vmem:[%s2402_s12 + $0x8] sm:$0xff] %v1141_v21 }
 0x33d   : > { %v1667_v22 = vpop.f32.mrb[20].mxu0 }
 0x33e   : > { %v1162_v23 = vadd.f32 %v1667_v22, %v2398_v14  ;;  %v1153_v24 = vpop.f32.mrb[21].mxu0 }
 0x33f   : > { %v1154_v25 = vadd.f32 %v2398_v14, %v1153_v24  ;;  %v1668_v38 = vpop.f32.mrb[22].mxu0 }
 0x340   : > { %1270 = vst [vmem:[%s2402_s12 + $0x30] sm:$0xff] %v1162_v23  ;;  %v1165_v26 = vadd.f32 %v1668_v38, %v2398_v14  ;;  %v1156_v0 = vpop.f32.mrb[23].mxu0 }
 0x341   : > { %1268 = vst [vmem:[%s2402_s12 + $0x20] sm:$0xff] %v1154_v25  ;;  %v1157_v27 = vadd.f32 %v2398_v14, %v1156_v0 }
 0x342   : > { %1271 = vst [vmem:[%s2402_s12 + $0x38] sm:$0xff] %v1165_v26 }
 0x343   : > { %1269 = vst [vmem:[%s2402_s12 + $0x28] sm:$0xff] %v1157_v27 }
 0x345   : > { %v1671_v29 = vpop.f32.mrb[24].mxu0 }
 0x346   : > { %v1178_v28 = vadd.f32 %v1671_v29, %v2398_v14  ;;  %v1169_v30 = vpop.f32.mrb[25].mxu0 }
 0x347   : > { %v1170_v31 = vadd.f32 %v2398_v14, %v1169_v30  ;;  %v1672_v32 = vpop.f32.mrb[26].mxu0 }
 0x348   : > { %1274 = vst [vmem:[%s2402_s12 + $0x50] sm:$0xff] %v1178_v28  ;;  %v1181_v33 = vadd.f32 %v1672_v32, %v2398_v14  ;;  %v1172_v34 = vpop.f32.mrb[27].mxu0 }
 0x349   : > { %1272 = vst [vmem:[%s2402_s12 + $0x40] sm:$0xff] %v1170_v31  ;;  %v1173_v35 = vadd.f32 %v2398_v14, %v1172_v34 }
 0x34a   : > { %1275 = vst [vmem:[%s2402_s12 + $0x58] sm:$0xff] %v1181_v33 }
 0x34b   : > { %1273 = vst [vmem:[%s2402_s12 + $0x48] sm:$0xff] %v1173_v35 }
 0x34d   : > { %v1675_v36 = vpop.f32.mrb[28].mxu0 }
 0x34e   : > { %v1194_v37 = vadd.f32 %v1675_v36, %v2398_v14  ;;  %v1185_v39 = vpop.f32.mrb[29].mxu0 }
 0x34f   : > { %v1186_v40 = vadd.f32 %v2398_v14, %v1185_v39  ;;  %v1676_v41 = vpop.f32.mrb[30].mxu0 }
 0x350   : > { %1278 = vst [vmem:[%s2402_s12 + $0x70] sm:$0xff] %v1194_v37  ;;  %v1197_v42 = vadd.f32 %v1676_v41, %v2398_v14  ;;  %v1188_v43 = vpop.f32.mrb[31].mxu0 }
 0x351   : > { %1276 = vst [vmem:[%s2402_s12 + $0x60] sm:$0xff] %v1186_v40  ;;  %v1189_v44 = vadd.f32 %v2398_v14, %v1188_v43 }
 0x352   : > { %1279 = vst [vmem:[%s2402_s12 + $0x78] sm:$0xff] %v1197_v42 }
 0x353   : > { %1277 = vst [vmem:[%s2402_s12 + $0x68] sm:$0xff] %v1189_v44 }
 0x355   : > { %v1679_v45 = vpop.f32.mrb[32].mxu0 }
 0x356   : > { %v1210_v46 = vadd.f32 %v1679_v45, %v2398_v14  ;;  %v1201_v47 = vpop.f32.mrb[33].mxu0 }
 0x357   : > { %v1202_v48 = vadd.f32 %v2398_v14, %v1201_v47  ;;  %v1680_v49 = vpop.f32.mrb[34].mxu0 }
 0x358   : > { %1282 = vst [vmem:[%s2402_s12 + $0x90] sm:$0xff] %v1210_v46  ;;  %v1213_v50 = vadd.f32 %v1680_v49, %v2398_v14  ;;  %v1204_v51 = vpop.f32.mrb[35].mxu0 }
 0x359   : > { %1280 = vst [vmem:[%s2402_s12 + $0x80] sm:$0xff] %v1202_v48  ;;  %v1205_v52 = vadd.f32 %v2398_v14, %v1204_v51 }
 0x35a   : > { %1283 = vst [vmem:[%s2402_s12 + $0x98] sm:$0xff] %v1213_v50 }
 0x35b   : > { %1281 = vst [vmem:[%s2402_s12 + $0x88] sm:$0xff] %v1205_v52 }
 0x35d   : > { %v1683_v53 = vpop.f32.mrb[36].mxu0 }
 0x35e   : > { %v1226_v54 = vadd.f32 %v1683_v53, %v2398_v14  ;;  %v1217_v55 = vpop.f32.mrb[37].mxu0 }
 0x35f   : > { %v1218_v56 = vadd.f32 %v2398_v14, %v1217_v55  ;;  %v1684_v57 = vpop.f32.mrb[38].mxu0 }
 0x360   : > { %1286 = vst [vmem:[%s2402_s12 + $0xb0] sm:$0xff] %v1226_v54  ;;  %v1229_v58 = vadd.f32 %v1684_v57, %v2398_v14  ;;  %v1220_v59 = vpop.f32.mrb[39].mxu0 }
 0x361   : > { %1284 = vst [vmem:[%s2402_s12 + $0xa0] sm:$0xff] %v1218_v56  ;;  %v1221_v60 = vadd.f32 %v2398_v14, %v1220_v59 }
 0x362   : > { %1287 = vst [vmem:[%s2402_s12 + $0xb8] sm:$0xff] %v1229_v58 }
 0x363   : > { %1285 = vst [vmem:[%s2402_s12 + $0xa8] sm:$0xff] %v1221_v60 }
 0x365   : > { %v1687_v61 = vpop.f32.mrb[40].mxu0 }
 0x366   : > { %v1242_v62 = vadd.f32 %v1687_v61, %v2398_v14  ;;  %v1233_v63 = vpop.f32.mrb[41].mxu0 }
 0x367   : > { %v1234_v1 = vadd.f32 %v2398_v14, %v1233_v63  ;;  %v1688_v2 = vpop.f32.mrb[42].mxu0 }
 0x368   : > { %1290 = vst [vmem:[%s2402_s12 + $0xd0] sm:$0xff] %v1242_v62  ;;  %v1245_v4 = vadd.f32 %v1688_v2, %v2398_v14  ;;  %v1236_v5 = vpop.f32.mrb[43].mxu0 }
 0x369   : > { %1288 = vst [vmem:[%s2402_s12 + $0xc0] sm:$0xff] %v1234_v1  ;;  %v1237_v6 = vadd.f32 %v2398_v14, %v1236_v5 }
 0x36a   : > { %1291 = vst [vmem:[%s2402_s12 + $0xd8] sm:$0xff] %v1245_v4 }
 0x36b   : > { %1289 = vst [vmem:[%s2402_s12 + $0xc8] sm:$0xff] %v1237_v6 }
 0x36d   : > { %v1691_v7 = vpop.f32.mrb[44].mxu0 }
 0x36e   : > { %v1258_v8 = vadd.f32 %v1691_v7, %v2398_v14  ;;  %v1249_v9 = vpop.f32.mrb[45].mxu0 }
 0x36f   : > { %v1250_v10 = vadd.f32 %v2398_v14, %v1249_v9  ;;  %v1692_v11 = vpop.f32.mrb[46].mxu0 }
 0x370   : > { %1294 = vst [vmem:[%s2402_s12 + $0xf0] sm:$0xff] %v1258_v8  ;;  %v1261_v12 = vadd.f32 %v1692_v11, %v2398_v14  ;;  %v1252_v13 = vpop.f32.mrb[47].mxu0 }
 0x371   : > { %1292 = vst [vmem:[%s2402_s12 + $0xe0] sm:$0xff] %v1250_v10  ;;  %v1253_v15 = vadd.f32 %v2398_v14, %v1252_v13 }
 0x372   : > { %1295 = vst [vmem:[%s2402_s12 + $0xf8] sm:$0xff] %v1261_v12 }
 0x373   : > { %1293 = vst [vmem:[%s2402_s12 + $0xe8] sm:$0xff] %v1253_v15 }
 0x374   : > { %1957 = shalt.err (!%p1954_p4)
}
 0x375   : > { %s1958_s15 = scalar_lea.hbm %s2467_s11, 4096  ;;  %s1962_s8 = scalar_lea.hbm %s2524_s7, 8192 }
 0x376   : > { %p1959_p9 = scmp.ne.s32.totalorder %s2467_s11, %s1958_s15  ;;  %p1963_p8 = scmp.lt.u32.totalorder %s2467_s11, %s2524_s7 }
 0x377   : > { %p1964_p13 = scmp.lt.u32.totalorder %s1962_s8, %s1958_s15  ;;  %p1966_p10 = scmp.lt.u32.totalorder %s1958_s15, %s2467_s11 }
 0x378   : > { %p1960_p0 = pnand %p1959_p9, %p2223_p5 }
 0x379   : > { %p1965_p6 = por %p1964_p13, %p1963_p8 }
 0x37a   : > { %p1961_p11 = pneg %p1960_p0 }
 0x37b   : > { %p1967_p3 = por %p1966_p10, %p1965_p6 }
 0x37d   : > { %p1968_p7 = pnand %p1967_p3, %p1961_p11 }
 0x37f   : > { %1971 = shalt.err (!%p1968_p7)
}
 0x380   : > { %s2027_s29 = smov 128   ;;  %s2028_s23 = smov 8  }
 0x381   : > { %1723 = dma.vmem_to_hbm [thread:$0]  (%p2223_p5), %s2469_s16, 4096, %s2467_s11, %s1297_s28, %s2027_s29, %s2027_s29, %s2028_s23  }
 0x382 PF: > { %s2544_s20 = sld [smem:[#allocation15_spill]]  ;;  %s1325_s30 = sand.u32 1, %s2006_s24  }
 0x383   : > { %p2546_p1 = scmp.ge.s32.totalorder %s2018_s27, 2  ;;  %s1326_s9 = scalar_lea.sflag [#allocation4], %s1325_s30 }
 0x388   : > { %p2545_p12 = scmp.ne.s32.totalorder %s2544_s20, 0 }
 0x38a   : > { %p1740_p2 = pnand %p2546_p1, %p2545_p12 }
 0x38c   : > { %2001 = dma.done.wait (!%p1740_p2), %s1326_s9, 4096  }
 0x38d   : > { %2003 = vsyncadd (!%p1740_p2), %s1326_s9, 4294963200  ;;  %p22_p4 = scmp.ge.s32.totalorder %s2209_s22, 4   ;;  %s2547_s24 = smov %s2010_s25 }
 0x38e   : > { %s2548_s25 = smov %s2014_s26  ;;  %s2549_s26 = smov %s2219_s18 }
 0x38f   : > { %s2550_s27 = smov %s2209_s22  ;;  %24 = sbr.rel (!%p22_p4) target bundleno = 7 (0x7), region = 105 }
 0x396   :  { %1331 = vsyncpa [#allocation3], 1 }
 0x397   :  { %1333 = vsyncpa [#allocation3 + $0x1], 1 }
 0x398   :  { %1334 = vsyncpa [#allocation6], 1 }
 0x399   :  { %1335 = vsyncpa [#allocation9], 1 }
 0x39a   :  { %1336 = vsyncpa [#allocation4], 1 }
 0x39b   :  { %1338 = vsyncpa [#allocation4 + $0x1], 1 }

</bundles_post_ra>
